<compile_context>
chip_gen: v5e
topology: v5e:2x2
jax: 0.10.0
libtpu: 0.0.40
codegen_flags: <defaults>
</compile_context>

<pallas_src>
import functools
import math

import jax
import jax.numpy as jnp
from jax import lax
from jax.experimental import pallas as pl
from jax.experimental.pallas import tpu as pltpu

# ----------------------------- toy config ------------------------------------
T = 16                        # num_tokens (flat vLLM token layout)
TQ = 8                        # query-token tile (grid axis)
HIDDEN = 128                  # hidden_size (lane-dense stores)
NUM_HEADS = 4
NUM_KV_HEADS = 2
HEAD_DIM = HIDDEN // NUM_HEADS          # 32
D2 = HEAD_DIM // 2
GROUP = NUM_HEADS // NUM_KV_HEADS
INTER = 256                   # intermediate_size (gate/up split at 128-lane multiple)
EPS = 1e-6
ROPE_THETA = 10000.0
SCALE = 1.0 / math.sqrt(HEAD_DIM)
MASK_VALUE = -1e30            # finite mask value (no -inf -> NaN for masked rows)


# ----------------------------- fused Pallas kernel ---------------------------
def fused_decoder_layer_kernel(*refs, has_residual):
    """add+RMSNorm -> q_proj_swiftkv -> RoPE -> causal GQA attention -> o_proj
    -> add+RMSNorm -> SwiGLU MLP, for one TQ-token query tile."""
    if has_residual:
        (x_ref, res_ref, kt_ref, v_ref, cos_ref, sin_a_ref, sin_b_ref,
         ln1_ref, wq_ref, wo_ref, ln2_ref, wgu_ref, wd_ref,
         out_ref, newres_ref) = refs
    else:
        (x_ref, kt_ref, v_ref, cos_ref, sin_a_ref, sin_b_ref,
         ln1_ref, wq_ref, wo_ref, ln2_ref, wgu_ref, wd_ref,
         out_ref, newres_ref) = refs

    f32 = jnp.float32
    x = x_ref[...]                                           # (TQ, HIDDEN)

    # ---- input_layernorm: (fused residual add +) RMSNorm ---------------------
    if has_residual:
        res1 = x + res_ref[...]
    else:
        res1 = x                                             # specialized path
    var1 = jnp.mean(res1 * res1, axis=-1, keepdims=True)
    h = res1 * lax.rsqrt(var1 + EPS) * ln1_ref[...]

    # ---- q_proj_swiftkv + slab-level neox RoPE --------------------------------
    q = jnp.dot(h, wq_ref[...], preferred_element_type=f32)  # (TQ, H*D)
    # rotate_half via two native 128-lane rolls (positive shift & axis); sign
    # and per-half selection folded into the precomputed sin_a / sin_b tables.
    q_rope = (q * cos_ref[...]
              + pltpu.roll(q, shift=HIDDEN - D2, axis=1) * sin_a_ref[...]
              + pltpu.roll(q, shift=D2, axis=1) * sin_b_ref[...])

    # ---- causal GQA attention over the full (toy) K/V -------------------------
    # TODO(synk): replace with flash-style KV tiling + causal tile skipping at
    #             production sequence lengths (T^2 f32 scores won't fit VMEM).
    k_t = kt_ref[...]                                        # (KVH*D, T), K pre-transposed
    v = v_ref[...]                                           # (T, KVH*D)
    q0 = pl.program_id(0) * TQ
    row = q0 + lax.broadcasted_iota(jnp.int32, (TQ, T), 0)
    col = lax.broadcasted_iota(jnp.int32, (TQ, T), 1)
    causal = col <= row

    head_outs = []
    for g in range(NUM_KV_HEADS):                            # KV slices hoisted
        khT = k_t[g * HEAD_DIM:(g + 1) * HEAD_DIM, :]        # (D, T)
        vh = v[:, g * HEAD_DIM:(g + 1) * HEAD_DIM]           # (T, D)
        for j in range(GROUP):                               # static q-head loop
            hh = g * GROUP + j
            qh = q_rope[:, hh * HEAD_DIM:(hh + 1) * HEAD_DIM]    # (TQ, D)
            s = jnp.dot(qh, khT, preferred_element_type=f32) * SCALE
            s = jnp.where(causal, s, MASK_VALUE)
            m = jnp.max(s, axis=-1, keepdims=True)
            p = jnp.exp(s - m)
            p = p * pl.reciprocal(jnp.sum(p, axis=-1, keepdims=True), approx=True)
            head_outs.append(jnp.dot(p, vh, preferred_element_type=f32))
    attn = jnp.concatenate(head_outs, axis=-1)               # (TQ, HIDDEN), lane-dense

    # ---- o_proj + post_attention_layernorm ------------------------------------
    attn_out = jnp.dot(attn, wo_ref[...], preferred_element_type=f32)
    res2 = attn_out + res1
    newres_ref[...] = res2.astype(newres_ref.dtype)          # 128-lane unmasked store
    var2 = jnp.mean(res2 * res2, axis=-1, keepdims=True)
    h2 = res2 * lax.rsqrt(var2 + EPS) * ln2_ref[...]

    # ---- MLP (SwiGLU) with fused gate+up weight -------------------------------
    gu = jnp.dot(h2, wgu_ref[...], preferred_element_type=f32)   # (TQ, 2*INTER)
    gate, up = gu[:, :INTER], gu[:, INTER:]                  # split at 128-lane multiple
    a = (gate * jax.nn.sigmoid(gate)) * up
    out_ref[...] = jnp.dot(a, wd_ref[...],
                           preferred_element_type=f32).astype(out_ref.dtype)


# ----------------------------- glue (plain JAX) -------------------------------
@functools.lru_cache(maxsize=None)
def _roll_is_jnp_like() -> bool:
    """One-time probe of pltpu.roll's rotation direction on this backend.
    Only the pairing of the two sin tables with the two roll shifts depends on
    it, so RoPE is correct for either convention."""
    def probe(x_ref, o_ref):
        o_ref[...] = pltpu.roll(x_ref[...], shift=1, axis=1)
    x = jnp.broadcast_to(jnp.arange(128, dtype=jnp.float32), (8, 128))
    y = pl.pallas_call(probe,
                       out_shape=jax.ShapeDtypeStruct((8, 128), jnp.float32))(x)
    return bool(y[0, 1] == 0.0)           # jnp.roll semantics: out[j] = in[j-1]


def rope_tables(positions):
    """Head-tiled, sign-folded RoPE tables (position-only; compute once).

    Returns (cos, sin_lo, sin_hi), each (T, NUM_HEADS*HEAD_DIM), per head:
      cos    = [cos,  cos]
      sin_lo = [-sin,   0]   (multiplies the roll that pulls the second half)
      sin_hi = [  0,  sin]   (multiplies the roll that pulls the first half)
    """
    inv_freq = 1.0 / (ROPE_THETA ** (jnp.arange(0, D2, dtype=jnp.float32) * 2.0 / HEAD_DIM))
    freqs = positions.astype(jnp.float32)[:, None] * inv_freq[None, :]    # (T, D2)
    cos, sin = jnp.cos(freqs), jnp.sin(freqs)
    zeros = jnp.zeros_like(sin)
    cos_h = jnp.concatenate([cos, cos], axis=-1)
    sin_lo = jnp.concatenate([-sin, zeros], axis=-1)
    sin_hi = jnp.concatenate([zeros, sin], axis=-1)
    tile = lambda t: jnp.tile(t, (1, NUM_HEADS))
    return tile(cos_h), tile(sin_lo), tile(sin_hi)


def decoder_layer(positions, hidden_states, k_states, v_states, residual, params,
                  rope=None):
    """Pallas implementation of LlamaSwiftKVDecoderLayer.forward (fully fused)."""
    if rope is None:
        rope = rope_tables(positions)
    cos_t, sin_lo, sin_hi = rope
    sin_a, sin_b = (sin_lo, sin_hi) if _roll_is_jnp_like() else (sin_hi, sin_lo)

    has_residual = residual is not None
    num_tokens = hidden_states.shape[0]

    # Stream K pre-transposed as (KVH*D, T): kernel score matmul is qh @ khT.
    # TODO(synk): in vLLM, emit K in this layout from kv_proj_swiftkv upstream.
    k_t = k_states.T

    def tok_spec():                       # per-query-tile activation block
        return pl.BlockSpec((TQ, HIDDEN), lambda i: (i, 0))

    def full_spec(shape):                 # VMEM-resident across token tiles
        return pl.BlockSpec(shape, lambda i: (0,) * len(shape))

    inputs, in_specs = [hidden_states], [tok_spec()]
    if has_residual:
        inputs.append(residual)
        in_specs.append(tok_spec())
    inputs += [k_t, v_states, cos_t, sin_a, sin_b,
               params["input_ln"], params["wq"], params["wo"], params["post_ln"],
               params["wgu"], params["wd"]]
    in_specs += [full_spec(k_t.shape), full_spec(v_states.shape),
                 tok_spec(), tok_spec(), tok_spec(),
                 full_spec(params["input_ln"].shape), full_spec(params["wq"].shape),
                 full_spec(params["wo"].shape), full_spec(params["post_ln"].shape),
                 full_spec(params["wgu"].shape), full_spec(params["wd"].shape)]

    out, new_residual = pl.pallas_call(
        functools.partial(fused_decoder_layer_kernel, has_residual=has_residual),
        grid=(num_tokens // TQ,),
        in_specs=in_specs,
        out_specs=(tok_spec(), tok_spec()),
        out_shape=(jax.ShapeDtypeStruct((num_tokens, HIDDEN), hidden_states.dtype),
                   jax.ShapeDtypeStruct((num_tokens, HIDDEN), hidden_states.dtype)),
        compiler_params=pltpu.CompilerParams(
            dimension_semantics=("parallel",)),   # v7x: token tiles split over 2 TCs
    )(*inputs)
    return out, new_residual


# ----------------------------- pure-JAX reference -----------------------------
def ref_decoder_layer(positions, hidden_states, k_states, v_states, residual, params):
    def rmsnorm(x, w):
        var = jnp.mean(x * x, axis=-1, keepdims=True)
        return x * lax.rsqrt(var + EPS) * w

    if residual is None:
        residual = hidden_states
        h = rmsnorm(hidden_states, params["input_ln"])
    else:
        residual = hidden_states + residual
        h = rmsnorm(residual, params["input_ln"])

    n = hidden_states.shape[0]
    q = (h @ params["wq"]).reshape(n, NUM_HEADS, HEAD_DIM)
    inv_freq = 1.0 / (ROPE_THETA ** (jnp.arange(0, D2, dtype=jnp.float32) * 2.0 / HEAD_DIM))
    freqs = positions.astype(jnp.float32)[:, None] * inv_freq[None, :]
    cos, sin = jnp.cos(freqs)[:, None, :], jnp.sin(freqs)[:, None, :]
    q1, q2 = q[..., :D2], q[..., D2:]
    q = jnp.concatenate([q1 * cos - q2 * sin, q2 * cos + q1 * sin], axis=-1)

    k = jnp.repeat(k_states.reshape(n, NUM_KV_HEADS, HEAD_DIM), GROUP, axis=1)
    v = jnp.repeat(v_states.reshape(n, NUM_KV_HEADS, HEAD_DIM), GROUP, axis=1)

    scores = jnp.einsum("qhd,khd->hqk", q, k) * SCALE
    mask = jnp.tril(jnp.ones((n, n), dtype=bool))
    scores = jnp.where(mask[None], scores, -jnp.inf)
    p = jax.nn.softmax(scores, axis=-1)
    attn = jnp.einsum("hqk,khd->qhd", p, v).reshape(n, HIDDEN)
    attn_out = attn @ params["wo"]

    residual = attn_out + residual
    h2 = rmsnorm(residual, params["post_ln"])
    g, u = h2 @ params["wg"], h2 @ params["wu"]
    out = (jax.nn.silu(g) * u) @ params["wd"]
    return out, residual


# ----------------------------- main -------------------------------------------
def init_params(key):
    ks = jax.random.split(key, 7)
    s = 0.05
    p = {
        "wq": jax.random.normal(ks[0], (HIDDEN, NUM_HEADS * HEAD_DIM), jnp.float32) * s,
        "wo": jax.random.normal(ks[1], (NUM_HEADS * HEAD_DIM, HIDDEN), jnp.float32) * s,
        "wg": jax.random.normal(ks[2], (HIDDEN, INTER), jnp.float32) * s,
        "wu": jax.random.normal(ks[3], (HIDDEN, INTER), jnp.float32) * s,
        "wd": jax.random.normal(ks[4], (INTER, HIDDEN), jnp.float32) * s,
        "input_ln": 1.0 + 0.1 * jax.random.normal(ks[5], (1, HIDDEN), jnp.float32),
        "post_ln": 1.0 + 0.1 * jax.random.normal(ks[6], (1, HIDDEN), jnp.float32),
    }
    # One-time repack (checkpoint load time): fused gate+up weight.
    p["wgu"] = jnp.concatenate([p["wg"], p["wu"]], axis=1)
    return p


if __name__ == "__main__":
    key = jax.random.PRNGKey(0)
    kp, k1, k2, k3, k4 = jax.random.split(key, 5)
    params = init_params(kp)

    positions = jnp.arange(T, dtype=jnp.int32)
    hidden_states = jax.random.normal(k1, (T, HIDDEN), jnp.float32)
    k_states = jax.random.normal(k2, (T, NUM_KV_HEADS * HEAD_DIM), jnp.float32)
    v_states = jax.random.normal(k3, (T, NUM_KV_HEADS * HEAD_DIM), jnp.float32)
    residual_in = jax.random.normal(k4, (T, HIDDEN), jnp.float32)

    rope = rope_tables(positions)     # position-only; reuse for every layer

    # Case 1: residual is None (first SwiftKV layer) — specialized kernel path.
    out1, res1 = decoder_layer(positions, hidden_states, k_states, v_states,
                               None, params, rope)
    out1, res1 = jax.block_until_ready(out1), jax.block_until_ready(res1)

    # Case 2: residual provided.
    out2, res2 = decoder_layer(positions, hidden_states, k_states, v_states,
                               residual_in, params, rope)
    out2, res2 = jax.block_until_ready(out2), jax.block_until_ready(res2)

    ref_out1, ref_res1 = ref_decoder_layer(positions, hidden_states, k_states,
                                           v_states, None, params)
    ref_out2, ref_res2 = ref_decoder_layer(positions, hidden_states, k_states,
                                           v_states, residual_in, params)

    assert jnp.allclose(out1, ref_out1, rtol=2e-3, atol=2e-3), "out1 mismatch"
    assert jnp.allclose(res1, ref_res1, rtol=2e-3, atol=2e-3), "res1 mismatch"
    assert jnp.allclose(out2, ref_out2, rtol=2e-3, atol=2e-3), "out2 mismatch"
    assert jnp.allclose(res2, ref_res2, rtol=2e-3, atol=2e-3), "res2 mismatch"

    print("KERNEL_OK")
</pallas_src>

<mosaic_0001>
module attributes {stable_mosaic.version = 11 : i64} {
  func.func @probe(%arg0: memref<8x128xf32, #tpu.memory_space<vmem>>, %arg1: memref<8x128xf32, #tpu.memory_space<vmem>>) attributes {dimension_semantics = [], scalar_prefetch = 0 : i64, scratch_operands = 0 : i64, tpu.core_type = #tpu.core_type<tc>} {
    %c0 = arith.constant 0 : index
    %c0_0 = arith.constant 0 : index
    %0 = vector.load %arg0[%c0, %c0_0] : memref<8x128xf32, #tpu.memory_space<vmem>>, vector<8x128xf32>
    %c1_i32 = arith.constant 1 : i32
    %1 = tpu.dynamic_rotate %0 by %c1_i32 dim 1 : vector<8x128xf32>, i32 -> vector<8x128xf32>
    %c0_1 = arith.constant 0 : index
    %c0_2 = arith.constant 0 : index
    %2 = vector.load %arg1[%c0_1, %c0_2] : memref<8x128xf32, #tpu.memory_space<vmem>>, vector<8x128xf32>
    tpu.vector_store %arg1[%c0_1, %c0_2], %1 {strides = array<i32>} : memref<8x128xf32, #tpu.memory_space<vmem>>, vector<8x128xf32>,
    return
  }
}

</mosaic_0001>

<bundles_post_ra>
// kernel: tpu_custom_call.1
= control target key start
LH: loop header
LB: loop body
LE: loop exit
PB: predicated region body
PF: predicated region fallthrough
CT: control target
= control target key end

     0   :  { %6 = vsyncpa [#allocation3], 0  ;;  %s118_s0 = inlined_call_operand.hbm [shape: f32[8,128], index: 0, kind: input, shape index: {}]   ;;  %s119_s1 = inlined_call_operand.hbm [shape: f32[8,128], index: 1, kind: output, shape index: {}]  }
   0x1   :  { %7 = vsyncpa [#allocation4], 0  ;;  %s13_s8 = sshll.u32 %s118_s0, 4  ;;  %s99_s9 = smov [#allocation2]   ;;  %s14_s8 = int_to_ptr.hbm [resolvable:$true] %s13_s8 }
   0x2   :  { %s15_s10 = sshll.u32 %s99_s9, 4  ;;  %s16_s10 = int_to_ptr.vmem [resolvable:$true] %s15_s10 }
   0x3   :  { %18 = dma.hbm_to_vmem [thread:$0]  %s14_s8, 128, %s16_s10, [#allocation3]  }
   0x4   :  { %95 = dma.done.wait [#allocation3], 128  }
   0x5   :  { %96 = vsyncadd [#allocation3], 4294967168  ;;  %v23_v0 = vld [vmem:[#allocation2] sm:$0xff]  ;;  %s100_s11 = smov 1   ;;  %s101_s12 = smov [#allocation5]  }
   0x6   :  { %24 = vrot.lane.b32.xlu0 %v23_v0, %s100_s11  ;;  %s32_s13 = sshll.u32 %s101_s12, 4  ;;  %s34_s16 = sshll.u32 %s119_s1, 4  ;;  %s33_s13 = int_to_ptr.vmem [resolvable:$true] %s32_s13  ;;  %s35_s16 = int_to_ptr.hbm [resolvable:$true] %s34_s16 }
  0x78   :  { %v25_v1 = vpop.permute.xlu0 %24 }
  0x79   :  { %26 = vst [vmem:[#allocation5] sm:$0xff] %v25_v1 }
  0x7a   :  { %37 = dma.vmem_to_hbm [thread:$0]  %s33_s13, 128, %s35_s16, [#allocation4]  }
  0x7b   :  { %97 = dma.done.wait [#allocation4], 128  }
  0x7c   :  { %98 = vsyncadd [#allocation4], 4294967168 }
  0x7d   :  { %42 = vsyncpa [#allocation3], 1 }
  0x7e   :  { %43 = vsyncpa [#allocation4], 1 }

</bundles_post_ra>
